<compile_context>
chip_gen: v7x
topology: tpu7x:2x2x1
jax: 0.10.0
libtpu: 0.0.40
codegen_flags: <defaults>
</compile_context>

<pallas_src>
import jax
import jax.numpy as jnp
from jax.experimental import pallas as pl
from jax.experimental.pallas import tpu as pltpu

_LANES = 128                        # vreg lane count (fast axis)
_SUBLANES = 8                       # vreg sublane count for 32-bit dtypes
_TARGET_BLOCK_BYTES = 4 * 1024 * 1024   # ~4 MiB per pipeline block
_VMEM_LIMIT_BYTES = 40 * 1024 * 1024    # 3 in-bufs + 2 out-bufs x 4 MiB + headroom


def identity_kernel(x_ref, o_ref):
    # Pure copy: one full-tile vector load + store per grid step.
    o_ref[...] = x_ref[...]


def _block_rows_for(dtype):
    """Rows per ~4 MiB lane-dense block, aligned to the packed-sublane size."""
    itemsize = jnp.dtype(dtype).itemsize
    pack = _SUBLANES * max(1, 4 // itemsize)    # 8 (f32), 16 (bf16), 32 (i8/fp8)
    rows = max(pack, _TARGET_BLOCK_BYTES // (_LANES * itemsize))
    return (rows // pack) * pack


_PIPELINED_PARAMS = pltpu.CompilerParams(
    dimension_semantics=("parallel",),
    vmem_limit_bytes=_VMEM_LIMIT_BYTES,
)
_SINGLE_BLOCK_PARAMS = pltpu.CompilerParams(
    vmem_limit_bytes=_VMEM_LIMIT_BYTES,
)


def _identity_single_block(x2):
    """One full-array block; for inputs that fit in a single pipeline block."""
    return pl.pallas_call(
        identity_kernel,
        out_shape=jax.ShapeDtypeStruct(x2.shape, x2.dtype),
        in_specs=[pl.BlockSpec(x2.shape, lambda: (0, 0))],
        out_specs=pl.BlockSpec(x2.shape, lambda: (0, 0)),
        input_output_aliases={0: 0},
        compiler_params=_SINGLE_BLOCK_PARAMS,
    )(x2)


def _identity_lane_dense(x2, block_rows):
    """Pipelined copy of a lane-dense [rows, 128] slab with a cdiv grid."""
    rows, lanes = x2.shape
    grid = (pl.cdiv(rows, block_rows),)         # partial tail block is masked
    return pl.pallas_call(
        identity_kernel,
        out_shape=jax.ShapeDtypeStruct(x2.shape, x2.dtype),
        grid=grid,
        in_specs=[pl.BlockSpec((block_rows, lanes), lambda i: (i, 0),
                               pipeline_mode=pl.Buffered(3))],
        out_specs=pl.BlockSpec((block_rows, lanes), lambda i: (i, 0)),
        input_output_aliases={0: 0},
        compiler_params=_PIPELINED_PARAMS,
    )(x2)


def _forward_impl(x):
    """Pallas implementation of DummyModule.forward: returns x unchanged."""
    # NOTE: the zero-cost implementation is simply `return x`; the kernel below
    # exists only because a pallas_call is required for this exercise.
    if x.ndim == 0 or x.size == 0:
        return x

    total = x.size
    pad = (-total) % _LANES
    flat = x.reshape(-1)
    if pad:
        # Route non-128-divisible sizes through the lane-dense path with a tiny
        # pad instead of a whole-array VMEM block (old fallback OOM hazard).
        flat = jnp.pad(flat, (0, pad))
    rows = flat.size // _LANES
    x2 = flat.reshape(rows, _LANES)             # lane-dense 2-D slab

    block_rows = _block_rows_for(x.dtype)
    if rows <= block_rows:
        y2 = _identity_single_block(x2)         # small input: no pipeline needed
    else:
        y2 = _identity_lane_dense(x2, block_rows)

    y = y2.reshape(-1)
    if pad:
        y = y[:total]
    return y.reshape(x.shape)


# Donate the input so input_output_aliases={0:0} takes effect (no defensive
# HBM copy of x before the kernel).
dummy_module_forward = jax.jit(_forward_impl, donate_argnums=0)


if __name__ == "__main__":
    key = jax.random.PRNGKey(0)
    shape, dtype = (2, 4, 16, 16), jnp.float32
    x = jax.random.normal(key, shape, dtype=dtype)
    # x is donated to the jitted call; regenerate identical values for the check.
    x_expected = jax.random.normal(key, shape, dtype=dtype)

    y = dummy_module_forward(x)
    jax.block_until_ready(y)

    assert y.shape == shape and y.dtype == dtype
    assert bool(jnp.all(y == x_expected))

    print("KERNEL_OK")
</pallas_src>

<mosaic_0001>
module attributes {stable_mosaic.version = 11 : i64} {
  func.func @identity_kernel(%arg0: memref<16x128xf32, #tpu.memory_space<vmem>>, %arg1: memref<16x128xf32, #tpu.memory_space<vmem>>) attributes {dimension_semantics = [], scalar_prefetch = 0 : i64, scratch_operands = 0 : i64, tpu.core_type = #tpu.core_type<tc>} {
    %c0 = arith.constant 0 : index
    %c0_0 = arith.constant 0 : index
    %0 = vector.load %arg0[%c0, %c0_0] : memref<16x128xf32, #tpu.memory_space<vmem>>, vector<16x128xf32>
    %c0_1 = arith.constant 0 : index
    %c0_2 = arith.constant 0 : index
    %1 = vector.load %arg1[%c0_1, %c0_2] : memref<16x128xf32, #tpu.memory_space<vmem>>, vector<16x128xf32>
    tpu.vector_store %arg1[%c0_1, %c0_2], %0 {strides = array<i32>} : memref<16x128xf32, #tpu.memory_space<vmem>>, vector<16x128xf32>,
    return
  }
}

</mosaic_0001>

<bundles_post_ra>
// kernel: _forward_impl.1
= control target key start
LH: loop header
LB: loop body
LE: loop exit
PB: predicated region body
PF: predicated region fallthrough
CT: control target
= control target key end

     0   :  { %s38_s0 = inlined_call_operand.vmem [shape: f32[16,128], index: 0, kind: input, shape index: {}, may-alias: {0,1}]   ;;  %s39_s1 = inlined_call_operand.vmem [shape: f32[16,128], index: 1, kind: output, shape index: {}, may-alias: {0,1}]  }
   0x1   :  { %v8_v0 = vld [vmem:[%s38_s0] sm:$0xff]  ;;  %v9_v1 = vld [vmem:[%s38_s0 + $0x8] sm:$0xff] }
   0x2   :  { %10 = vst [vmem:[%s39_s1] sm:$0xff] %v8_v0  ;;  %11 = vst [vmem:[%s39_s1 + $0x8] sm:$0xff] %v9_v1 }

</bundles_post_ra>
